<compile_context>
chip_gen: v6e
topology: v6e:2x2x1
jax: 0.10.0
libtpu: 0.0.40
codegen_flags: <defaults>
</compile_context>

<pallas_src>
import numpy as np
import jax
import jax.numpy as jnp
from jax.experimental import pallas as pl
from jax.experimental.pallas import tpu as pltpu

_MAX_TILE_ELEMS = 2 * 1024 * 1024      # 8 MiB of f32 entropy per grid step
_SUBLANE_ALIGN = 32                    # int8 output vreg tile is (32, 128)
_VMEM_LIMIT_BYTES = 40 * 1024 * 1024   # well under 64 MiB (v7x) / 128 MiB (v5e/v6e)


def _cdiv(a, b):
    return -(-a // b)


def _gate_index_kernel(thr_ref, e_ref, idx_ref):
    """thr_ref: SMEM (2,) f32 = [median_thr, fine_thr]
       e_ref:   VMEM (T, L) f32 entropy tile
       idx_ref: VMEM (T, L) int8 class index: 0=coarse, 1=median, 2=fine, 3=none."""
    e = e_ref[...]
    thr_median = thr_ref[0]
    thr_fine = thr_ref[1]
    # thr_median <= thr_fine by construction, so two compares classify every
    # finite value; NaN (all ordered compares False) is routed to class 3 so
    # its one-hot expansion is all-False, matching the PyTorch comparisons.
    gt_median = (e > thr_median).astype(jnp.int32)
    gt_fine = (e > thr_fine).astype(jnp.int32)
    idx = gt_median + gt_fine
    idx = jnp.where(jnp.isnan(e), 3, idx)
    idx_ref[...] = idx.astype(jnp.int8)


def _num_tensorcores_per_device():
    """Best-effort: dual-TensorCore devices (v7x, v4/v5p megacore) want >=2
    'parallel' grid steps; single-TC v5e/v6e keep minimal steps."""
    try:
        kind = jax.devices()[0].device_kind.lower()
    except Exception:
        return 1
    if any(tag in kind for tag in ("7", "v4", "v5p")):
        return 2
    return 1


def _pick_lane(total):
    """Largest lane-dense width (multiple of 128) dividing `total`, so the
    common shapes avoid the jnp.pad copy entirely."""
    for lane in (512, 1024, 2048, 256, 128):
        if total % lane == 0:
            return lane, 0
    lane = 128
    return lane, (-total) % lane


def _choose_row_tile(rows, lane, min_steps):
    """Tile-first: pick the largest VMEM-friendly row tile; only on dual-TC
    chips cap it so the grid has at least `min_steps` steps."""
    if rows <= _SUBLANE_ALIGN:
        return rows                                   # block == full dim
    max_tile = max(_SUBLANE_ALIGN,
                   ((_MAX_TILE_ELEMS // lane) // _SUBLANE_ALIGN) * _SUBLANE_ALIGN)
    tile = min(rows, max_tile)
    if min_steps > 1:
        split = max(_SUBLANE_ALIGN,
                    ((rows // min_steps) // _SUBLANE_ALIGN) * _SUBLANE_ALIGN)
        tile = min(tile, split)
    if tile < rows:                                   # tiled blocks: keep aligned
        tile = max(_SUBLANE_ALIGN, (tile // _SUBLANE_ALIGN) * _SUBLANE_ALIGN)
    return tile


@jax.jit
def _gate_from_thresholds(entropy, thresholds):
    """entropy: any-shape float array; thresholds: (2,) f32 [median, fine].
    Returns a bool gate of shape entropy.shape + (3,)."""
    shape = entropy.shape
    total = int(np.prod(shape)) if shape else 1

    e_flat = entropy.reshape(-1).astype(jnp.float32)
    lane, pad = _pick_lane(total)
    if pad:
        # TODO(synk): totals that are not a multiple of 128 pay one extra copy
        # here; all lane-divisible shapes go straight to the kernel.
        e_flat = jnp.pad(e_flat, (0, pad))
    rows = (total + pad) // lane
    e2d = e_flat.reshape(rows, lane)

    row_tile = _choose_row_tile(rows, lane, _num_tensorcores_per_device())
    grid = (_cdiv(rows, row_tile),)

    idx = pl.pallas_call(
        _gate_index_kernel,
        out_shape=jax.ShapeDtypeStruct((rows, lane), jnp.int8),
        grid=grid,
        in_specs=[
            pl.BlockSpec(memory_space=pltpu.MemorySpace.SMEM),   # thresholds
            pl.BlockSpec((row_tile, lane), lambda i: (i, 0)),    # entropy tile
        ],
        out_specs=pl.BlockSpec((row_tile, lane), lambda i: (i, 0)),
        compiler_params=pltpu.CompilerParams(
            dimension_semantics=("parallel",),
            vmem_limit_bytes=_VMEM_LIMIT_BYTES),
    )(thresholds, e2d)

    idx_flat = idx.reshape(-1)
    if pad:
        idx_flat = idx_flat[:total]
    # Single fused XLA pass: expand the 1-byte class index to the (..., 3)
    # bool one-hot.  Class 3 (NaN) expands to all-False, like PyTorch.
    gate = idx_flat.reshape(shape)[..., None] == jnp.arange(3, dtype=jnp.int8)
    return gate


class TripleGrainDynamicEntropyRouterPallas:
    """forward(h_coarse, h_median, h_fine, entropy) -> bool gate entropy.shape+(3,).
    h_* are accepted but unused, exactly as in the PyTorch module."""

    def __init__(self, fine_grain_ratio_min=0.01, fine_grain_ratio_max=0.99,
                 seed=0):
        self.fine_grain_ratio_min = fine_grain_ratio_min
        self.fine_grain_ratio_max = fine_grain_ratio_max
        # Deterministic host RNG mirroring np.random.uniform in the PyTorch
        # module (fresh thresholds every forward).
        self._rng = np.random.default_rng(seed)
        self.last_thresholds = None

    def __call__(self, h_coarse, h_median, h_fine, entropy=None):
        median_thr, fine_thr = self._rng.uniform(
            low=[self.fine_grain_ratio_min, self.fine_grain_ratio_max / 2],
            high=[self.fine_grain_ratio_max / 2, self.fine_grain_ratio_max],
        )
        self.last_thresholds = (float(median_thr), float(fine_thr))
        thresholds = jnp.asarray([median_thr, fine_thr], dtype=jnp.float32)
        return _gate_from_thresholds(entropy, thresholds)


def _reference_gate(entropy, thr_median, thr_fine):
    gate_fine = (entropy > thr_fine)[..., None]
    gate_median = ((entropy <= thr_fine) & (entropy > thr_median))[..., None]
    gate_coarse = (entropy <= thr_median)[..., None]
    return jnp.concatenate([gate_coarse, gate_median, gate_fine], axis=-1)


if __name__ == "__main__":
    key = jax.random.PRNGKey(0)
    k1, k2, k3, k4 = jax.random.split(key, 4)

    B, C, H, W = 2, 4, 16, 16
    # Unused feature maps (NCHW, different grains) — passed through like PyTorch.
    h_coarse = jax.random.normal(k1, (B, C, H // 4, W // 4), dtype=jnp.float32)
    h_median = jax.random.normal(k2, (B, C, H // 2, W // 2), dtype=jnp.float32)
    h_fine = jax.random.normal(k3, (B, C, H, W), dtype=jnp.float32)
    # Per-pixel entropy map at fine resolution, values in [0, 1).
    entropy = jax.random.uniform(k4, (B, H, W), dtype=jnp.float32)

    router = TripleGrainDynamicEntropyRouterPallas(seed=0)
    gate = jax.block_until_ready(
        router(h_coarse, h_median, h_fine, entropy=entropy))

    thr_median, thr_fine = router.last_thresholds
    ref = _reference_gate(entropy, thr_median, thr_fine)

    assert gate.shape == (B, H, W, 3)
    assert gate.dtype == jnp.bool_
    assert bool(jnp.all(gate == ref))
    # Exactly one grain selected per position for finite entropy.
    assert bool(jnp.all(jnp.sum(gate.astype(jnp.int32), axis=-1) == 1))

    # Ragged (pad fallback) shape + NaN edge case: the NaN position must be
    # all-False, matching the PyTorch comparison semantics.
    entropy2 = jax.random.uniform(jax.random.PRNGKey(1), (3, 7, 11),
                                  dtype=jnp.float32)
    entropy2 = entropy2.at[0, 0, 0].set(jnp.nan)
    gate2 = jax.block_until_ready(
        router(h_coarse, h_median, h_fine, entropy=entropy2))
    thr_m2, thr_f2 = router.last_thresholds
    ref2 = _reference_gate(entropy2, thr_m2, thr_f2)
    assert gate2.shape == (3, 7, 11, 3)
    assert bool(jnp.all(gate2 == ref2))
    assert not bool(jnp.any(gate2[0, 0, 0]))

    print("KERNEL_OK")
</pallas_src>

<mosaic_0001>
module attributes {stable_mosaic.version = 11 : i64} {
  func.func @_gate_index_kernel(%arg0: i32, %arg1: memref<2xf32, #tpu.memory_space<smem>>, %arg2: memref<1x512xf32, #tpu.memory_space<vmem>>, %arg3: memref<1x512xi8, #tpu.memory_space<vmem>>) attributes {dimension_semantics = [#tpu.dimension_semantics<parallel>], iteration_bounds = array<i64: 1>, scalar_prefetch = 0 : i64, scratch_operands = 0 : i64, tpu.core_type = #tpu.core_type<tc>, window_params = [{transform_indices = @transform_0, window_bounds = array<i64: 2>}, {transform_indices = @transform_1, window_bounds = array<i64: 1, 512>}, {transform_indices = @transform_2, window_bounds = array<i64: 1, 512>}]} {
    %c0 = arith.constant 0 : index
    %c0_0 = arith.constant 0 : index
    %0 = vector.load %arg2[%c0, %c0_0] : memref<1x512xf32, #tpu.memory_space<vmem>>, vector<1x512xf32>
    %c0_1 = arith.constant 0 : index
    %1 = memref.load %arg1[%c0_1] : memref<2xf32, #tpu.memory_space<smem>>
    %c1 = arith.constant 1 : index
    %2 = memref.load %arg1[%c1] : memref<2xf32, #tpu.memory_space<smem>>
    %3 = vector.broadcast %1 : f32 to vector<1x512xf32>
    %4 = arith.cmpf ogt, %0, %3 : vector<1x512xf32>
    %5 = arith.extui %4 : vector<1x512xi1> to vector<1x512xi32>
    %6 = vector.broadcast %2 : f32 to vector<1x512xf32>
    %7 = arith.cmpf ogt, %0, %6 : vector<1x512xf32>
    %8 = arith.extui %7 : vector<1x512xi1> to vector<1x512xi32>
    %9 = arith.addi %5, %8 : vector<1x512xi32>
    %10 = arith.cmpf one, %0, %0 : vector<1x512xf32>
    %c3_i32 = arith.constant 3 : i32
    %11 = vector.broadcast %c3_i32 : i32 to vector<1x512xi32>
    %12 = arith.select %10, %11, %9 : vector<1x512xi1>, vector<1x512xi32>
    %13 = arith.trunci %12 : vector<1x512xi32> to vector<1x512xi8>
    %c0_2 = arith.constant 0 : index
    %c0_3 = arith.constant 0 : index
    %14 = vector.load %arg3[%c0_2, %c0_3] : memref<1x512xi8, #tpu.memory_space<vmem>>, vector<1x512xi8>
    tpu.vector_store %arg3[%c0_2, %c0_3], %13 {strides = array<i32>} : memref<1x512xi8, #tpu.memory_space<vmem>>, vector<1x512xi8>,
    return
  }
  func.func @transform_0(%arg0: i32) -> i32 {
    %c0_i32 = arith.constant 0 : i32
    %c0_i32_0 = arith.constant 0 : i32
    return %c0_i32 : i32
  }
  func.func @transform_1(%arg0: i32) -> (i32, i32) {
    %c0_i32 = arith.constant 0 : i32
    %c0_i32_0 = arith.constant 0 : i32
    return %arg0, %c0_i32 : i32, i32
  }
  func.func @transform_2(%arg0: i32) -> (i32, i32) {
    %c0_i32 = arith.constant 0 : i32
    %c0_i32_0 = arith.constant 0 : i32
    return %arg0, %c0_i32 : i32, i32
  }
}

</mosaic_0001>

<bundles_post_ra>
// kernel: eq.8
= control target key start
LH: loop header
LB: loop body
LE: loop exit
PB: predicated region body
PF: predicated region fallthrough
CT: control target
= control target key end

     0   :  { %s115_s8 = smov 80   ;;  %vm20_vm0 = vcmask 130048   ;;  %s116_s9 = smov 96   ;;  %v121_v20 = vmov 0   ;;  %s155_s0 = inlined_call_operand.vmem [shape: s8[512], index: 0, kind: input, shape index: {}]   ;;  %s156_s1 = inlined_call_operand.vmem [shape: s8[2,16,16], index: 1, kind: output, shape index: {}]  }
   0x1   :  { %v13_v0 = vld [vmem:[%s155_s0] sm:$0x1]  ;;  %s114_s0 = smov 112   ;;  %s117_s10 = smov 64  }
   0x2   :  { %v14_v1 = vunpack.c.0.s8 %v13_v0  ;;  %s118_s11 = smov 48   ;;  %s119_s12 = smov 32  }
   0x3   :  { %s120_s13 = smov 16  }
   0x4   :  { %18 = vst [vmem:[#allocation1] sm:$0xf] %v14_v1 }
   0xb   :  { %v22_v2 = vld [vmem:[#allocation1] sm:$0xf]  }
   0xc   :  { %v34_v3 = vld [vmem:[#allocation1] sm:$0xf]   ;;  %23 = vrot.lane.b32.xlu0 %v22_v2, %s114_s0 }
   0xd   :  { %35 = vrot.lane.b32.xlu1 %v34_v3, %s115_s8  ;;  %v28_v4 = vld [vmem:[#allocation1] sm:$0xf]  }
   0xe   :  { %v40_v5 = vld [vmem:[#allocation1] sm:$0xf]  }
   0xf   :  { %v19_v6 = vld [vmem:[#allocation1] sm:$0xf]  }
  0x10   :  { %21 = vst.msk [vmem:[#allocation0] ss:$8 sm:$0xf] %vm20_vm0, %v19_v6   ;;  %29 = vrot.lane.b32.xlu0 %v28_v4, %s116_s9  ;;  %v46_v7 = vld [vmem:[#allocation1] sm:$0xf]  }
  0x11   :  { %41 = vrot.lane.b32.xlu1 %v40_v5, %s117_s10  ;;  %v52_v8 = vld [vmem:[#allocation1] sm:$0xf]  }
  0x12   :  { %v58_v9 = vld [vmem:[#allocation1] sm:$0xf]  }
  0x14   :  { %47 = vrot.lane.b32.xlu0 %v46_v7, %s118_s11 }
  0x15   :  { %53 = vrot.lane.b32.xlu1 %v52_v8, %s119_s12 }
  0x18   :  { %59 = vrot.lane.b32.xlu0 %v58_v9, %s120_s13 }
  0x7e   :  { %v24_v10 = vpop.permute.xlu0 %23  }
  0x7f   :  { %v36_v11 = vpop.permute.xlu1 %35   ;;  %27 = vst.msk [vmem:[#allocation0 + $0x1] ss:$8 sm:$0xf] %vm20_vm0, %v24_v10  }
  0x80   :  { %39 = vst.msk [vmem:[#allocation0 + $0x3] ss:$8 sm:$0xf] %vm20_vm0, %v36_v11  }
  0x82   :  { %v30_v12 = vpop.permute.xlu0 %29  }
  0x83   :  { %v42_v13 = vpop.permute.xlu1 %41   ;;  %33 = vst.msk [vmem:[#allocation0 + $0x2] ss:$8 sm:$0xf] %vm20_vm0, %v30_v12  }
  0x84   :  { %45 = vst.msk [vmem:[#allocation0 + $0x4] ss:$8 sm:$0xf] %vm20_vm0, %v42_v13  }
  0x86   :  { %v48_v14 = vpop.permute.xlu0 %47  }
  0x87   :  { %v54_v15 = vpop.permute.xlu1 %53   ;;  %51 = vst.msk [vmem:[#allocation0 + $0x5] ss:$8 sm:$0xf] %vm20_vm0, %v48_v14  }
  0x88   :  { %57 = vst.msk [vmem:[#allocation0 + $0x6] ss:$8 sm:$0xf] %vm20_vm0, %v54_v15  }
  0x8a   :  { %v60_v16 = vpop.permute.xlu0 %59  }
  0x8b   :  { %63 = vst.msk [vmem:[#allocation0 + $0x7] ss:$8 sm:$0xf] %vm20_vm0, %v60_v16  }
  0x92   :  { %v69_v17 = vld [vmem:[#allocation0] sm:$0xff]  ;;  %v76_v18 = vld [vmem:[#allocation0 + $0x8] sm:$0xff]  ;;  %v84_v19 = vld [vmem:[#allocation0 + $0x10] sm:$0xff] }
  0x93   :  { %v72_v21 = vpack.c.b16 %v121_v20, %v69_v17  ;;  %v80_v22 = vpack.c.b16 %v121_v20, %v76_v18  ;;  %v89_v23 = vpack.c.b16 %v121_v20, %v84_v19  ;;  %v93_v24 = vld [vmem:[#allocation0 + $0x18] sm:$0xff] }
  0x94   :  { %v98_v25 = vpack.c.b16 %v121_v20, %v93_v24 }
  0x95   :  { %v73_v26 = vpack.c.b8 %v121_v20, %v72_v21  ;;  %v81_v27 = vpack.c.b8 %v121_v20, %v80_v22  ;;  %v90_v28 = vpack.c.b8 %v121_v20, %v89_v23 }
  0x96   :  { %v99_v29 = vpack.c.b8 %v121_v20, %v98_v25 }
  0x97   :  { %74 = vst [vmem:[%s156_s1] sm:$0x3] %v73_v26  ;;  %103 = vst [vmem:[%s156_s1 + $0x2] sm:$0x3] %v81_v27 }
  0x98   :  { %104 = vst [vmem:[%s156_s1 + $0x4] sm:$0x3] %v90_v28  ;;  %105 = vst [vmem:[%s156_s1 + $0x6] sm:$0x3] %v99_v29 }

// kernel: _gate_from_thresholds.1
= control target key start
LH: loop header
LB: loop body
LE: loop exit
PB: predicated region body
PF: predicated region fallthrough
CT: control target
= control target key end

     0   :  { %7 = vsyncpa [#allocation3], 0  ;;  %s171_s0 = inlined_call_operand.vmem [shape: f32[2], index: 0, kind: input, shape index: {}]   ;;  %s172_s1 = inlined_call_operand.vmem [shape: f32[1,512], index: 1, kind: input, shape index: {}]   ;;  %s173_s2 = inlined_call_operand.vmem [shape: s8[1,512], index: 2, kind: output, shape index: {}]  }
   0x1   :  { %s14_s11 = sshll.u32 %s171_s0, 4  ;;  %s15_s11 = int_to_ptr.vmem [resolvable:$true] %s14_s11 }
   0x2   :  { %s113_s12 = scalar_lea.vmem %s15_s11, 16  ;;  %p118_p1 = scmp.lt.s32.totalorder %s15_s11, %s15_s11 }
   0x3   :  { %p114_p0 = scmp.ne.s32.totalorder %s15_s11, %s113_s12  ;;  %p119_p2 = scmp.lt.s32.totalorder %s113_s12, %s113_s12 }
   0x5   :  { %p120_p3 = por %p119_p2, %p118_p1 }
   0x7   :  { %p121_p4 = pnand %p120_p3, %p114_p0 }
   0x9   :  { %124 = shalt.err (!%p121_p4)
}
   0xa   :  { %s127_s13 = smov [#allocation2]  }
   0xb   :  { %17 = dma.vmem_to_smem %s15_s11, 16, %s127_s13, [#allocation3]  }
   0xc   :  { %125 = dma.done.wait [#allocation3], 16  }
   0xd   :  { %126 = vsyncadd [#allocation3], 4294967280 }
   0xe   :  { %23 = sfence }
   0xf   :  { %s25_s14 = sld [smem:[#allocation2]]  ;;  %v36_v0 = vlaneseq  ;;  %v24_v1 = vld [vmem:[%s172_s1] sm:$0xf]  ;;  %v128_v4 = vmov 1966171168   ;;  %vm84_vm1 = vcmask 1040384  }
  0x10   :  { %s107_s15 = sld [smem:[#allocation2 + $0x1]]  ;;  %vm34_vm0 = vcmp.ne.f32.partialorder %v24_v1, %v24_v1  ;;  %v63_v5 = vunpack.c.l.s4 %v128_v4  ;;  %vm85_vm3 = vsmask.f32 0  ;;  %vm87_vm4 = vcmask 1041409   ;;  %v99_v33 = vld [vmem:[%s173_s2] sm:$0xf] }
  0x11   :  { %v37_v2 = vshrl.u32 %v36_v0, 7  ;;  %v129_v7 = vmov 0   ;;  %vm88_vm6 = vsmask.f32 1024  ;;  %vm152_vm7 = vmand %vm84_vm1, %vm85_vm3  ;;  %vm91_vm9 = vcmask 1042434  }
  0x12   :  { %v64_v15 = vunpack.c.0.s8 %v63_v5  ;;  %vm156_vm8 = vmand %vm87_vm4, %vm88_vm6  ;;  %vm92_vm10 = vsmask.f32 2048  ;;  %vm95_vm13 = vcmask 1043459   ;;  %vm96_vm14 = vsmask.f32 3072 }
  0x13   :  { %v38_v9 = vsub.s32 0, %v37_v2  ;;  %v42_v11 = vsub.s32 1, %v37_v2  ;;  %v46_v12 = vsub.s32 2, %v37_v2  ;;  %v50_v13 = vsub.s32 3, %v37_v2  ;;  %vm90_vm11 = vmor %vm156_vm8, %vm152_vm7 }
  0x14   :  { %v67_v23 = vsub.s32 %v64_v15, %v37_v2  ;;  %vm93_vm12 = vmand %vm91_vm9, %vm92_vm10 }
  0x15   :  { %v27_v3 = vstv %s25_s14  ;;  %vm94_vm15 = vmor %vm93_vm12, %vm90_vm11 }
  0x16   :  { %vm28_vm2 = vcmp.gt.f32.partialorder %v24_v1, %v27_v3  ;;  %v30_v6 = vstv %s107_s15 }
  0x17   :  { %v29_v8 = vsel %vm28_vm2, 1, %v129_v7  ;;  %vm31_vm5 = vcmp.gt.f32.partialorder %v24_v1, %v30_v6 }
  0x18   :  { %v32_v10 = vsel %vm31_vm5, 1, %v129_v7 }
  0x19   :  { %v33_v14 = vadd.s32 %v32_v10, %v29_v8 }
  0x1b   :  { %v35_v18 = vsel %vm34_vm0, 3, %v33_v14  ;;  %vm97_vm0 = vmand %vm95_vm13, %vm96_vm14 }
  0x1c   :  { %v39_v19 = vrot.slane %v35_v18, %v38_v9  ;;  %v43_v20 = vrot.slane %v35_v18, %v42_v11  ;;  %v47_v21 = vrot.slane %v35_v18, %v46_v12  ;;  %v51_v22 = vrot.slane %v35_v18, %v50_v13  ;;  %vm98_vm1 = vmor %vm97_vm0, %vm94_vm15 }
  0x1e   :  { %v52_v24 = vpack.c.b16 %v39_v19, %v39_v19  ;;  %v54_v25 = vpack.c.b16 %v43_v20, %v43_v20  ;;  %v56_v26 = vpack.c.b16 %v47_v21, %v47_v21  ;;  %v58_v27 = vpack.c.b16 %v51_v22, %v51_v22 }
  0x20   :  { %v108_v28 = vpack.c.b8 %v54_v25, %v52_v24  ;;  %v109_v29 = vpack.c.b8 %v58_v27, %v56_v26 }
  0x22   :  { %v68_v30 = vrot.slane %v108_v28, %v67_v23  ;;  %v75_v31 = vrot.slane %v109_v29, %v67_v23 }
  0x24   :  { %v76_v32 = vcombine.low %v68_v30, %v75_v31 }
  0x26   :  { %v83_v34 = vrot.slane %v76_v32, %v67_v23 }
  0x28   :  { %v100_v35 = vsel %vm98_vm1, %v83_v34, %v99_v33 }
  0x29   :  { %101 = vst [vmem:[%s173_s2] sm:$0xf] %v100_v35 }
  0x2a   :  { %106 = vsyncpa [#allocation3], 1 }

</bundles_post_ra>
